<compile_context>
chip_gen: v7x
topology: tpu7x:2x2x1
jax: 0.10.0
libtpu: 0.0.40
codegen_flags: <defaults>
</compile_context>

<pallas_src>
import functools

import jax
import jax.numpy as jnp
from jax.experimental import pallas as pl
from jax.experimental.pallas import tpu as pltpu


def _round_up(x, m):
    return ((x + m - 1) // m) * m


# ----------------------------------------------------------------------------
# Pallas kernel 1: fused  y = relu?( (x @ w_folded) + bias (+ residual) )
# (conv-as-matmul; FrozenBatchNorm scale pre-folded into w, bias kept f32)
# K is a grid reduction axis with an f32 VMEM accumulator.
# ----------------------------------------------------------------------------
def _mm_bn_kernel(*refs, relu, add_res, n_k):
    if add_res:
        x_ref, w_ref, bi_ref, res_ref, o_ref, acc_ref = refs
    else:
        x_ref, w_ref, bi_ref, o_ref, acc_ref = refs
        res_ref = None
    k = pl.program_id(1)

    @pl.when(k == 0)
    def _():
        acc_ref[...] = jnp.zeros_like(acc_ref)

    acc_ref[...] += jnp.dot(x_ref[...], w_ref[...],
                            preferred_element_type=jnp.float32)

    @pl.when(k == n_k - 1)
    def _():
        y = acc_ref[...] + bi_ref[...]
        if add_res:
            y = y + res_ref[...].astype(jnp.float32)
        if relu:
            y = jnp.maximum(y, 0.0)
        o_ref[...] = y.astype(o_ref.dtype)


def matmul_bn(x, w, bias, residual=None, relu=True,
              tm_max=256, tk_max=512, out_dtype=jnp.bfloat16):
    """x: (M, K), w: (K, N) bf16 (scale folded), bias: (N,) f32,
    residual: optional (M, N).  Returns (M, N) in out_dtype.
    tm_max: use 128 on v5e (4x128^2 MXU), 256 on v6e/v7x."""
    M, K = x.shape
    Kw, N = w.shape
    assert Kw == K
    x = x.astype(jnp.bfloat16)
    w = w.astype(jnp.bfloat16)
    bias2 = bias.reshape(1, N).astype(jnp.float32)

    # Fixed row tile, never the full M; pad M up to a multiple of tm.
    tm = min(tm_max, _round_up(M, 8))
    Mp = _round_up(M, tm)
    # Tile K only when it is large (3x3 conv: K = 9*C); otherwise one K step.
    if K > tk_max:
        tk = tk_max
        Kp = _round_up(K, tk)
    else:
        tk = K
        Kp = K
    n_m, n_k = Mp // tm, Kp // tk

    if Mp != M or Kp != K:
        x = jnp.pad(x, ((0, Mp - M), (0, Kp - K)))
    if Kp != K:
        w = jnp.pad(w, ((0, Kp - K), (0, 0)))

    in_specs = [
        pl.BlockSpec((tm, tk), lambda i, k: (i, k)),
        pl.BlockSpec((tk, N), lambda i, k: (k, 0)),
        pl.BlockSpec((1, N), lambda i, k: (0, 0)),
    ]
    args = [x, w, bias2]
    if residual is not None:
        res = residual.astype(jnp.bfloat16)
        if Mp != M:
            res = jnp.pad(res, ((0, Mp - M), (0, 0)))
        in_specs.append(pl.BlockSpec((tm, N), lambda i, k: (i, 0)))
        args.append(res)

    kernel = functools.partial(_mm_bn_kernel, relu=relu,
                               add_res=residual is not None, n_k=n_k)
    out = pl.pallas_call(
        kernel,
        out_shape=jax.ShapeDtypeStruct((Mp, N), out_dtype),
        grid=(n_m, n_k),
        in_specs=in_specs,
        out_specs=pl.BlockSpec((tm, N), lambda i, k: (i, 0)),
        scratch_shapes=[pltpu.VMEM((tm, N), jnp.float32)],
        compiler_params=pltpu.CompilerParams(
            dimension_semantics=("parallel", "arbitrary")),
    )(*args)
    if Mp != M:
        out = out[:M]
    return out


# ----------------------------------------------------------------------------
# Pallas kernel 2: ROIAlign pooling reduction  pooled_r = S_r @ feat[batch(r)]
# grid = (channel_tiles, ROIs); ROIs are pre-sorted by batch index so the
# feature slab is only re-DMA'd when the image (or channel tile) changes.
# ----------------------------------------------------------------------------
def _roi_pool_kernel(bidx_ref, s_ref, f_ref, o_ref):
    del bidx_ref  # consumed by the index_map only
    o_ref[...] = jnp.dot(s_ref[...], f_ref[...],
                         preferred_element_type=jnp.float32)


def roi_pool(sample_mat, feat_flat, batch_idx, tc_max=512):
    """sample_mat: (R, Pp, H*W), feat_flat: (N, H*W, C), batch_idx: (R,) i32
    (assumed sorted by batch).  Returns (R, Pp, C) f32."""
    R, Pp, HW = sample_mat.shape
    N, _, C = feat_flat.shape
    if C > tc_max:
        assert C % tc_max == 0, "channel tiling requires C % tc_max == 0"
        tc = tc_max
    else:
        tc = C
    n_c = C // tc

    return pl.pallas_call(
        _roi_pool_kernel,
        out_shape=jax.ShapeDtypeStruct((R, Pp, C), jnp.float32),
        grid_spec=pltpu.PrefetchScalarGridSpec(
            num_scalar_prefetch=1,
            grid=(n_c, R),
            in_specs=[
                pl.BlockSpec((None, Pp, HW), lambda c, r, b: (r, 0, 0)),
                pl.BlockSpec((None, HW, tc), lambda c, r, b: (b[r], 0, c)),
            ],
            out_specs=pl.BlockSpec((None, Pp, tc), lambda c, r, b: (r, 0, c)),
        ),
        compiler_params=pltpu.CompilerParams(
            dimension_semantics=("parallel", "arbitrary")),
    )(batch_idx, sample_mat.astype(jnp.bfloat16),
      feat_flat.astype(jnp.bfloat16))


# ----------------------------------------------------------------------------
# ROIAlign sampling-weight matrix (data-dependent coords, built in plain JAX)
# ----------------------------------------------------------------------------
def roi_align_matrix(boxes, spatial_scale, H, W, resolution, sampling_ratio):
    """boxes: (R, 4) xyxy in image coords. Returns S: (R, res*res, H*W)."""
    # TODO(synk): restrict S / the pooled matmul to a cropped per-ROI feature
    # window (scalar-prefetched row offsets) instead of the dense (res^2, H*W)
    # matrix; kept dense here for lowering robustness.
    n = sampling_ratio
    x1 = boxes[:, 0] * spatial_scale
    y1 = boxes[:, 1] * spatial_scale
    x2 = boxes[:, 2] * spatial_scale
    y2 = boxes[:, 3] * spatial_scale
    roi_w = jnp.maximum(x2 - x1, 1.0)
    roi_h = jnp.maximum(y2 - y1, 1.0)
    bin_w = roi_w / resolution
    bin_h = roi_h / resolution

    p = jnp.arange(resolution, dtype=jnp.float32)
    s = jnp.arange(n, dtype=jnp.float32)
    # sample coordinates, shape (R, res, n)
    ys = (y1[:, None, None] + p[None, :, None] * bin_h[:, None, None]
          + (s[None, None, :] + 0.5) * bin_h[:, None, None] / n)
    xs = (x1[:, None, None] + p[None, :, None] * bin_w[:, None, None]
          + (s[None, None, :] + 0.5) * bin_w[:, None, None] / n)

    def axis_weights(coords, size):
        valid = ((coords >= -1.0) & (coords <= size)).astype(jnp.float32)
        c = jnp.clip(coords, 0.0, size - 1.0)
        grid = jnp.arange(size, dtype=jnp.float32)
        w = jnp.maximum(0.0, 1.0 - jnp.abs(c[..., None] - grid))
        return w * valid[..., None]

    wy = axis_weights(ys, H)  # (R, res, n, H)
    wx = axis_weights(xs, W)  # (R, res, n, W)
    S = jnp.einsum('rpih,rqjw->rpqhw', wy, wx) / float(n * n)
    R = boxes.shape[0]
    return S.reshape(R, resolution * resolution, H * W)


def pooler_neighbor(features_nchw, rois, *, neighbor_expand, roi_expand,
                    resolution, scale, sampling_ratio):
    """features: (N, C, H, W); rois: (R, 5) = [batch_idx, x1, y1, x2, y2]."""
    N, C, H, W = features_nchw.shape
    R = rois.shape[0]
    feat_flat = jnp.transpose(features_nchw, (0, 2, 3, 1)).reshape(N, H * W, C)

    # Sort ROIs by batch index so consecutive grid steps reuse the same
    # feature block (Pallas re-DMAs only when the block index changes).
    batch_idx = rois[:, 0].astype(jnp.int32)
    order = jnp.argsort(batch_idx)
    inv_order = jnp.argsort(order)
    rois_s = rois[order]
    batch_idx_s = batch_idx[order]
    boxes = rois_s[:, 1:5]

    # TODO(synk): exact PoolerNeighbor box-expansion semantics are fork-specific;
    # approximated as expanding each box about its center by neighbor_expand*roi_expand.
    expand = neighbor_expand * roi_expand
    cx = (boxes[:, 0] + boxes[:, 2]) * 0.5
    cy = (boxes[:, 1] + boxes[:, 3]) * 0.5
    bw = (boxes[:, 2] - boxes[:, 0]) * expand
    bh = (boxes[:, 3] - boxes[:, 1]) * expand
    eboxes = jnp.stack(
        [cx - bw * 0.5, cy - bh * 0.5, cx + bw * 0.5, cy + bh * 0.5], axis=1)

    S = roi_align_matrix(eboxes, scale, H, W, resolution, sampling_ratio)
    P = resolution * resolution
    Pp = _round_up(P, 8)                      # sublane-aligned pooled rows
    if Pp != P:
        S = jnp.pad(S, ((0, 0), (0, Pp - P), (0, 0)))

    pooled_s = roi_pool(S, feat_flat, batch_idx_s)        # (R, Pp, C) f32
    pooled_s = pooled_s[:, :P, :]
    pooled = pooled_s[inv_order]                          # undo the sort
    return pooled.reshape(R, resolution, resolution, C)   # NHWC


# ----------------------------------------------------------------------------
# ResNet head (conv5 stage: 3 bottleneck blocks, stride 2 in block 0)
# ----------------------------------------------------------------------------
def im2col_3x3(x_nhwc, stride=1):
    """x: (N, H, W, C) -> (N, Ho, Wo, 9*C), padding 1, tap order (kh, kw, cin)."""
    # TODO(synk): fuse the im2col into the 3x3-conv Pallas kernel (9 shifted
    # accumulating matmuls over a VMEM-resident padded tile) to avoid the 9x
    # activation round-trip through HBM; kept wrapper-side (bf16) for robustness.
    N, H, W, C = x_nhwc.shape
    xp = jnp.pad(x_nhwc, ((0, 0), (1, 1), (1, 1), (0, 0)))
    Ho = (H + 2 - 3) // stride + 1
    Wo = (W + 2 - 3) // stride + 1
    cols = []
    for dy in range(3):
        for dx in range(3):
            cols.append(xp[:, dy:dy + stride * (Ho - 1) + 1:stride,
                           dx:dx + stride * (Wo - 1) + 1:stride, :])
    return jnp.concatenate(cols, axis=-1)


def bottleneck_block(x_nhwc, p, *, stride, downsample):
    """BottleneckWithFixedBatchNorm, stride_in_1x1=True, dilation=1."""
    N, H, W, Cin = x_nhwc.shape
    xs = x_nhwc[:, ::stride, ::stride, :]          # stride applied in 1x1 convs
    Ho, Wo = xs.shape[1], xs.shape[2]
    xs_flat = xs.reshape(N * Ho * Wo, Cin)

    if downsample:
        identity = matmul_bn(xs_flat, p['w_ds'], p['b_ds'], relu=False)
    else:
        identity = xs_flat

    out = matmul_bn(xs_flat, p['w1'], p['b1'], relu=True)        # 1x1, stride s
    out = out.reshape(N, Ho, Wo, -1)
    cols = im2col_3x3(out, stride=1)                             # 3x3, pad 1
    out = matmul_bn(cols.reshape(N * Ho * Wo, -1), p['w2'], p['b2'], relu=True)
    out = matmul_bn(out, p['w3'], p['b3'],                       # 1x1 + residual
                    residual=identity, relu=True)
    return out.reshape(N, Ho, Wo, -1)


def init_head_params(key, in_c, bneck_c, out_c, num_blocks=3):
    """Raw params: conv weights (K, N) f32 + FrozenBN (scale, bias) per conv."""
    def conv(k, cin, cout):
        return 0.05 * jax.random.normal(k, (cin, cout), jnp.float32)

    def frozen_bn(k, c):
        k1, k2 = jax.random.split(k)
        scale = 1.0 + 0.1 * jax.random.normal(k1, (c,), jnp.float32)
        bias = 0.05 * jax.random.normal(k2, (c,), jnp.float32)
        return scale, bias

    blocks = []
    keys = jax.random.split(key, num_blocks)
    cin = in_c
    for i in range(num_blocks):
        ks = jax.random.split(keys[i], 8)
        blk = dict(
            w1=conv(ks[0], cin, bneck_c), bn1=frozen_bn(ks[1], bneck_c),
            w2=conv(ks[2], 9 * bneck_c, bneck_c), bn2=frozen_bn(ks[3], bneck_c),
            w3=conv(ks[4], bneck_c, out_c), bn3=frozen_bn(ks[5], out_c),
        )
        if i == 0:
            blk['w_ds'] = conv(ks[6], cin, out_c)
            blk['bn_ds'] = frozen_bn(ks[7], out_c)
        blocks.append(blk)
        cin = out_c
    return blocks


def prepare_head_params(raw_blocks):
    """One-time wrapper-side prep: fold FrozenBN scale into the (frozen)
    weights and cast them to bf16; biases stay f32."""
    prepped = []
    for blk in raw_blocks:
        p = {}
        for name in ('1', '2', '3'):
            w = blk['w' + name]
            scale, bias = blk['bn' + name]
            p['w' + name] = (w * scale[None, :]).astype(jnp.bfloat16)
            p['b' + name] = bias.astype(jnp.float32)
        if 'w_ds' in blk:
            scale, bias = blk['bn_ds']
            p['w_ds'] = (blk['w_ds'] * scale[None, :]).astype(jnp.bfloat16)
            p['b_ds'] = bias.astype(jnp.float32)
        prepped.append(p)
    return prepped


# ----------------------------------------------------------------------------
# Full module forward
# ----------------------------------------------------------------------------
def roi_feature_extractor_neighbor(features_nchw, rois, head_params, *,
                                   neighbor_expand=2.0, roi_expand=1.0,
                                   resolution=8, scale=1.0 / 16.0,
                                   sampling_ratio=2):
    pooled = pooler_neighbor(
        features_nchw, rois,
        neighbor_expand=neighbor_expand, roi_expand=roi_expand,
        resolution=resolution, scale=scale, sampling_ratio=sampling_ratio)
    x = pooled.astype(jnp.bfloat16)            # activations in bf16 in the head
    for i, p in enumerate(head_params):
        x = bottleneck_block(x, p, stride=(2 if i == 0 else 1),
                             downsample=(i == 0))
    # back to PyTorch NCHW convention: (R, C_out, res/2, res/2), f32
    return jnp.transpose(x, (0, 3, 1, 2)).astype(jnp.float32)


if __name__ == "__main__":
    key = jax.random.PRNGKey(0)
    k_feat, k_head = jax.random.split(key)

    # Small synthetic shapes (real module: C=1024 -> 2048, resolution=14).
    N, C, H, W = 2, 32, 16, 16
    IN_C, BNECK_C, OUT_C = 32, 16, 64
    RESOLUTION = 8

    features = jax.random.normal(k_feat, (N, C, H, W), jnp.float32)
    # proposals as ROIs: [batch_idx, x1, y1, x2, y2] in image coords (~256x256)
    rois = jnp.array([[0., 10., 20., 120., 140.],
                      [1., 4., 4., 250., 250.],
                      [0., 50., 60., 200., 220.],
                      [1., 30., 90., 90., 180.]], dtype=jnp.float32)

    raw_params = init_head_params(k_head, IN_C, BNECK_C, OUT_C, num_blocks=3)
    head_params = prepare_head_params(raw_params)   # fold BN scale, cast bf16

    out = roi_feature_extractor_neighbor(
        features, rois, head_params,
        neighbor_expand=2.0, roi_expand=1.0,
        resolution=RESOLUTION, scale=1.0 / 16.0, sampling_ratio=2)
    out = jax.block_until_ready(out)

    assert out.shape == (4, OUT_C, RESOLUTION // 2, RESOLUTION // 2), out.shape
    assert bool(jnp.all(jnp.isfinite(out)))
    print("KERNEL_OK")
</pallas_src>

<mosaic_0001>
module attributes {stable_mosaic.version = 11 : i64} {
  func.func @_roi_pool_kernel(%arg0: i32, %arg1: i32, %arg2: memref<4xi32, #tpu.memory_space<smem>>, %arg3: memref<1x64x256xbf16, #tpu.memory_space<vmem>>, %arg4: memref<1x256x32xbf16, #tpu.memory_space<vmem>>, %arg5: memref<1x64x32xf32, #tpu.memory_space<vmem>>) attributes {dimension_semantics = [#tpu.dimension_semantics<parallel>, #tpu.dimension_semantics<arbitrary>], iteration_bounds = array<i64: 1, 4>, scalar_prefetch = 1 : i64, scratch_operands = 0 : i64, tpu.core_type = #tpu.core_type<tc>, window_params = [{transform_indices = @transform_0, window_bounds = array<i64: 1, 64, 256>}, {transform_indices = @transform_1, window_bounds = array<i64: 1, 256, 32>}, {transform_indices = @transform_2, window_bounds = array<i64: 1, 64, 32>}]} {
    %c0 = arith.constant 0 : index
    %c0_0 = arith.constant 0 : index
    %c0_1 = arith.constant 0 : index
    %0 = vector.load %arg3[%c0, %c0_0, %c0_1] : memref<1x64x256xbf16, #tpu.memory_space<vmem>>, vector<1x64x256xbf16>
    %1 = vector.shape_cast %0 : vector<1x64x256xbf16> to vector<64x256xbf16>
    %c0_2 = arith.constant 0 : index
    %c0_3 = arith.constant 0 : index
    %c0_4 = arith.constant 0 : index
    %2 = vector.load %arg4[%c0_2, %c0_3, %c0_4] : memref<1x256x32xbf16, #tpu.memory_space<vmem>>, vector<1x256x32xbf16>
    %3 = vector.shape_cast %2 : vector<1x256x32xbf16> to vector<256x32xbf16>
    %cst = arith.constant dense<0.000000e+00> : vector<64x32xf32>
    %4 = tpu.matmul %1, %3, %cst {dimension_numbers = #tpu.dot_dimension_numbers<[1], [0], [0], [1], [0, 0, 1, 1], [], []>} : vector<64x256xbf16>, vector<256x32xbf16>, vector<64x32xf32> -> vector<64x32xf32>
    %c0_5 = arith.constant 0 : index
    %c0_6 = arith.constant 0 : index
    %c0_7 = arith.constant 0 : index
    %5 = vector.load %arg5[%c0_5, %c0_6, %c0_7] : memref<1x64x32xf32, #tpu.memory_space<vmem>>, vector<1x64x32xf32>
    %6 = vector.shape_cast %5 : vector<1x64x32xf32> to vector<64x32xf32>
    %7 = vector.shape_cast %4 : vector<64x32xf32> to vector<1x64x32xf32>
    tpu.vector_store %arg5[%c0_5, %c0_6, %c0_7], %7 {strides = array<i32>} : memref<1x64x32xf32, #tpu.memory_space<vmem>>, vector<1x64x32xf32>,
    return
  }
  func.func @transform_0(%arg0: i32, %arg1: i32, %arg2: memref<4xi32, #tpu.memory_space<smem>>) -> (i32, i32, i32) {
    %c0_i32 = arith.constant 0 : i32
    %c0_i32_0 = arith.constant 0 : i32
    %c0_i32_1 = arith.constant 0 : i32
    return %arg1, %c0_i32, %c0_i32_0 : i32, i32, i32
  }
  func.func @transform_1(%arg0: i32, %arg1: i32, %arg2: memref<4xi32, #tpu.memory_space<smem>>) -> (i32, i32, i32) {
    %0 = arith.index_cast %arg1 : i32 to index
    %1 = memref.load %arg2[%0] : memref<4xi32, #tpu.memory_space<smem>>
    %c0_i32 = arith.constant 0 : i32
    %c0_i32_0 = arith.constant 0 : i32
    return %1, %c0_i32, %arg0 : i32, i32, i32
  }
  func.func @transform_2(%arg0: i32, %arg1: i32, %arg2: memref<4xi32, #tpu.memory_space<smem>>) -> (i32, i32, i32) {
    %c0_i32 = arith.constant 0 : i32
    %c0_i32_0 = arith.constant 0 : i32
    return %arg1, %c0_i32, %arg0 : i32, i32, i32
  }
}

</mosaic_0001>

<bundles_post_ra>
// kernel: tpu_custom_call.1
= control target key start
LH: loop header
LB: loop body
LE: loop exit
PB: predicated region body
PF: predicated region fallthrough
CT: control target
= control target key end

     0   :  { %s855_s0 = inlined_call_operand.vmem [shape: s32[4], index: 0, kind: input, shape index: {}]   ;;  %s856_s1 = inlined_call_operand.vmem [shape: bf16[4,64,256], index: 1, kind: input, shape index: {}]   ;;  %s857_s2 = inlined_call_operand.vmem [shape: bf16[2,256,32], index: 2, kind: input, shape index: {}]   ;;  %s858_s3 = inlined_call_operand.vmem [shape: f32[4,64,32], index: 3, kind: output, shape index: {}]  }
   0x1   :  { %s8_s14 = sshll.u32 %s855_s0, 4  ;;  %s9_s14 = int_to_ptr.vmem [resolvable:$true] %s8_s14 }
   0x2   :  { %s704_s15 = scalar_lea.vmem %s9_s14, 16  ;;  %p709_p1 = scmp.lt.s32.totalorder %s9_s14, %s9_s14 }
   0x3   :  { %p705_p0 = scmp.ne.s32.totalorder %s9_s14, %s704_s15  ;;  %p710_p2 = scmp.lt.s32.totalorder %s704_s15, %s704_s15 }
   0x5   :  { %p711_p3 = por %p710_p2, %p709_p1 }
   0x7   :  { %p712_p4 = pnand %p711_p3, %p705_p0 }
   0x9   :  { %715 = shalt.err (!%p712_p4)  }
   0xa   :  { %s742_s16 = smov [#allocation3]  }
   0xb   :  { %11 = dma.vmem_to_smem %s9_s14, 16, %s742_s16, [#allocation2] }
   0xc   :  { %728 = dma.done.wait [#allocation2], 16 }
   0xd   :  { %729 = vsyncadd [#allocation2], 4294967280 }
   0xe   :  { %13 = sfence }
   0xf   :  { %s766_s17 = smov 0   ;;  %s768_s18 = smov 0  }
  0x10   :  { %s770_s19 = smov 0  }
  0x11 LB: > { %s28_s0 = sadd.s32 1, %s736_s18  ;;  %p559_p5 = scmp.ge.s32.totalorder %s740_s19, 1  ;;  %s740_s19 = sphi %s770_s19, %s19_s19   ;;  %s736_s18 = sphi %s768_s18, %s860_s18   ;;  %s732_s17 = sphi %s766_s17, %s859_s17  }
  0x12   : > { %p29_p6 = scmp.ge.s32.totalorder %s28_s0, 4  ;;  %p152_p7 = scmp.lt.s32.totalorder %s740_s19, 5 }
  0x14   : > { %s862_s0 = smov (%p29_p6, %s28_s0), 0  ;;  %p153_p8 = pnand %p559_p5, %p152_p7 }
  0x15   : > { %s191_s20 = sld [smem:[#allocation3 + %s732_s17]] (!%p153_p8)  ;;  %p186_p9 = scmp.lt.s32.totalorder (!%p153_p8), %s732_s17, 3  ;;  %vm451_vm0 = vcmask (!%p153_p8), 261120  }
  0x16   : > { %156 = sbr.rel (%p153_p8) target bundleno = 293 (0x125), region = 28 }
  0x1b   : > { %p192_p10 = scmp.lt.s32.totalorder (!%p153_p8), %s191_s20, 1 }
  0x1d   : > { %s864_s17 = smov (!%p186_p9, %s732_s17), 3  ;;  %s866_s20 = smov (!%p192_p10, %s191_s20), 1 }
  0x1e   : > { %s592_s21 = sshll.u32 %s864_s17, 6  ;;  %s593_s25 = sshll.u32 %s866_s20, 7 }
  0x1f   : > { %s792_s24 = scalar_lea.vmem %s856_s1, %s592_s21  ;;  %s799_s28 = scalar_lea.vmem %s857_s2, %s593_s25 }
  0x20   : > { %v694_v0 = vld [vmem:[%s792_s24 + $0x4] ss:$8 sps:$4 sm:$0xff]   ;;  %v680_v6 = vld [vmem:[%s799_s28 + $0x50] sm:$0xff]   ;;  %v682_v8 = vld [vmem:[%s799_s28 + $0x58] sm:$0xff]   ;;  %s828_s4 = scalar_lea.vmem %s858_s3, %s592_s21 }
  0x21   : > { %v697_v1 = vld [vmem:[%s792_s24 + $0x24] ss:$8 sps:$4 sm:$0xff]   ;;  %418 = vmatprep.mubr.bf16.mxu0 %v694_v0  ;;  %v681_v7 = vld [vmem:[%s799_s28 + $0x10] sm:$0xff]   ;;  %v683_v9 = vld [vmem:[%s799_s28 + $0x18] sm:$0xff]  }
  0x22   : > { %434 = vmatprep.mubr.bf16.mxu1 %v697_v1  ;;  %v676_v2 = vld [vmem:[%s799_s28 + $0x40] sm:$0xff]   ;;  %v678_v4 = vld [vmem:[%s799_s28 + $0x48] sm:$0xff]   ;;  %v688_v14 = vld [vmem:[%s799_s28 + $0x70] sm:$0xff]  }
  0x23   : > { %v677_v3 = vld [vmem:[%s799_s28] sm:$0xff]   ;;  %595 = vmatprep.subr.bf16.mxu0 %v676_v2  ;;  %635 = vmatprep.subr.bf16.mxu1 %v676_v2  ;;  %v679_v5 = vld [vmem:[%s799_s28 + $0x8] sm:$0xff]   ;;  %v689_v15 = vld [vmem:[%s799_s28 + $0x30] sm:$0xff]  }
  0x24   : > { %596 = vmatpush3.bf16.msra.mxu0 %v677_v3  ;;  %643 = vmatpush3.bf16.msra.mxu1 %v677_v3  ;;  %v684_v10 = vld [vmem:[%s799_s28 + $0x60] sm:$0xff]   ;;  %v686_v12 = vld [vmem:[%s799_s28 + $0x68] sm:$0xff]   ;;  %v690_v16 = vld [vmem:[%s799_s28 + $0x78] sm:$0xff]  }
  0x25   : > { %597 = vmatprep.subr.bf16.mxu0 %v678_v4  ;;  %636 = vmatprep.subr.bf16.mxu1 %v678_v4  ;;  %v685_v11 = vld [vmem:[%s799_s28 + $0x20] sm:$0xff]   ;;  %v687_v13 = vld [vmem:[%s799_s28 + $0x28] sm:$0xff]   ;;  %v691_v17 = vld [vmem:[%s799_s28 + $0x38] sm:$0xff]  }
  0x26   : > { %v692_v18 = vld [vmem:[%s792_s24] ss:$8 sps:$4 sm:$0xff]   ;;  %v698_v20 = vld [vmem:[%s792_s24 + $0x14] ss:$8 sps:$4 sm:$0xff]   ;;  %v702_v22 = vld [vmem:[%s792_s24 + $0x10] ss:$8 sps:$4 sm:$0xff]  }
  0x27   : > { %v695_v19 = vld [vmem:[%s792_s24 + $0x20] ss:$8 sps:$4 sm:$0xff]   ;;  %v700_v21 = vld [vmem:[%s792_s24 + $0x34] ss:$8 sps:$4 sm:$0xff]   ;;  %v703_v23 = vld [vmem:[%s792_s24 + $0x30] ss:$8 sps:$4 sm:$0xff]  }
  0x28   : > { %598 = vmatpush3.bf16.msra.mxu0 %v679_v5  ;;  %644 = vmatpush3.bf16.msra.mxu1 %v679_v5 }
  0x29   : > { %599 = vmatprep.subr.bf16.mxu0 %v680_v6  ;;  %637 = vmatprep.subr.bf16.mxu1 %v680_v6 }
  0x2c   : > { %600 = vmatpush3.bf16.msra.mxu0 %v681_v7  ;;  %645 = vmatpush3.bf16.msra.mxu1 %v681_v7 }
  0x2d   : > { %601 = vmatprep.subr.bf16.mxu0 %v682_v8  ;;  %638 = vmatprep.subr.bf16.mxu1 %v682_v8 }
  0x30   : > { %602 = vmatpush3.bf16.msra.mxu0 %v683_v9  ;;  %646 = vmatpush3.bf16.msra.mxu1 %v683_v9 }
  0x31   : > { %603 = vmatprep.subr.bf16.mxu0 %v684_v10  ;;  %639 = vmatprep.subr.bf16.mxu1 %v684_v10 }
  0x34   : > { %604 = vmatpush3.bf16.msra.mxu0 %v685_v11  ;;  %647 = vmatpush3.bf16.msra.mxu1 %v685_v11 }
  0x35   : > { %605 = vmatprep.subr.bf16.mxu0 %v686_v12  ;;  %640 = vmatprep.subr.bf16.mxu1 %v686_v12 }
  0x38   : > { %606 = vmatpush3.bf16.msra.mxu0 %v687_v13  ;;  %648 = vmatpush3.bf16.msra.mxu1 %v687_v13 }
  0x39   : > { %607 = vmatprep.subr.bf16.mxu0 %v688_v14  ;;  %641 = vmatprep.subr.bf16.mxu1 %v688_v14 }
  0x3c   : > { %608 = vmatpush3.bf16.msra.mxu0 %v689_v15  ;;  %649 = vmatpush3.bf16.msra.mxu1 %v689_v15 }
  0x3d   : > { %609 = vmatprep.subr.bf16.mxu0 %v690_v16  ;;  %642 = vmatprep.subr.bf16.mxu1 %v690_v16 }
  0x40   : > { %610 = vmatpush3.bf16.msra.mxu0 %v691_v17  ;;  %650 = vmatpush3.bf16.msra.mxu1 %v691_v17 }
  0x43   : > { %419 = vmatmul.mubr.bf16.vlgmr.msra.gmra.mrb[0].mxu0 %v692_v18  ;;  %435 = vmatmul.mubr.bf16.vlgmr.msra.gmra.mrb[0].mxu1 %v695_v19 }
  0x44   : > { %426 = vmatprep.mubr.bf16.mxu0 %v698_v20  ;;  %442 = vmatprep.mubr.bf16.mxu1 %v700_v21 }
  0x4b   : > { %427 = vmatmul.mubr.bf16.gmra.mrb[4].mxu0 %v702_v22  ;;  %443 = vmatmul.mubr.bf16.gmra.mrb[4].mxu1 %v703_v23 }
 0x116   : > { %v611_v24 = vpop.f32.mrb[0].mxu0  ;;  %v623_v25 = vpop.f32.mrb[0].mxu1 }
 0x117   : > { %v612_v26 = vpop.f32.mrb[1].mxu0  ;;  %v624_v27 = vpop.f32.mrb[1].mxu1 }
 0x118   : > { %v613_v28 = vadd.f32 %v612_v26, %v611_v24  ;;  %v625_v29 = vadd.f32 %v624_v27, %v623_v25  ;;  %v614_v30 = vpop.f32.mrb[2].mxu0  ;;  %v626_v31 = vpop.f32.mrb[2].mxu1 }
 0x119   : > { %v615_v32 = vpop.f32.mrb[3].mxu0  ;;  %v627_v33 = vpop.f32.mrb[3].mxu1 }
 0x11a   : > { %452 = vst.msk [vmem:[%s828_s4] sm:$0xff] %vm451_vm0, %v613_v28  ;;  %456 = vst.msk [vmem:[%s828_s4 + $0x20] sm:$0xff] %vm451_vm0, %v625_v29  ;;  %v616_v34 = vadd.f32 %v615_v32, %v614_v30  ;;  %v628_v35 = vadd.f32 %v627_v33, %v626_v31 }
 0x11c   : > { %453 = vst.msk [vmem:[%s828_s4 + $0x8] sm:$0xff] %vm451_vm0, %v616_v34  ;;  %457 = vst.msk [vmem:[%s828_s4 + $0x28] sm:$0xff] %vm451_vm0, %v628_v35 }
 0x11e   : > { %v617_v36 = vpop.f32.mrb[4].mxu0  ;;  %v629_v37 = vpop.f32.mrb[4].mxu1 }
 0x11f   : > { %v618_v38 = vpop.f32.mrb[5].mxu0  ;;  %v630_v39 = vpop.f32.mrb[5].mxu1 }
 0x120   : > { %v619_v40 = vadd.f32 %v618_v38, %v617_v36  ;;  %v631_v41 = vadd.f32 %v630_v39, %v629_v37  ;;  %v620_v42 = vpop.f32.mrb[6].mxu0  ;;  %v632_v43 = vpop.f32.mrb[6].mxu1 }
 0x121   : > { %v621_v44 = vpop.f32.mrb[7].mxu0  ;;  %v633_v45 = vpop.f32.mrb[7].mxu1 }
 0x122   : > { %454 = vst.msk [vmem:[%s828_s4 + $0x10] sm:$0xff] %vm451_vm0, %v619_v40  ;;  %458 = vst.msk [vmem:[%s828_s4 + $0x30] sm:$0xff] %vm451_vm0, %v631_v41  ;;  %v622_v46 = vadd.f32 %v621_v44, %v620_v42  ;;  %v634_v47 = vadd.f32 %v633_v45, %v632_v43 }
 0x124   : > { %455 = vst.msk [vmem:[%s828_s4 + $0x18] sm:$0xff] %vm451_vm0, %v622_v46  ;;  %459 = vst.msk [vmem:[%s828_s4 + $0x38] sm:$0xff] %vm451_vm0, %v634_v47 }
 0x125 PF: > { %s19_s19 = sadd.s32 1, %s740_s19   ;;  %s859_s17 = smov %s736_s18 }
 0x126   : > { %p16_p11 = scmp.ge.s32.totalorder %s19_s19, 6   ;;  %s860_s18 = smov %s862_s0 }
 0x128   :  { %18 = sbr.rel (!%p16_p11) target bundleno = 17 (0x11), region = 61 }

</bundles_post_ra>
